<compile_context>
chip_gen: v6e
topology: v6e:2x2x1
jax: 0.10.0
libtpu: 0.0.40
codegen_flags: <defaults>
</compile_context>

<pallas_src>
import functools

import jax
import jax.numpy as jnp
from jax.experimental import pallas as pl
from jax.experimental.pallas import tpu as pltpu

# ----------------------------- model dims (from __init__) -----------------------------
F_IN, H1, H2 = 27, 60, 50        # GCNConv(27,60), GCNConv(60,50)
D1, D2, D3 = 40, 20, 1           # Linear(50,40), Linear(40,20), Linear(20,1)

LANE = 128
SUB = 8
F_P = 32                         # features 27 -> 32 (full-dim block, 4x less X DMA than 128)
OUT_P = 128                      # output 1 -> 128 (lane-dense stores; sliced back on host)


def _round_up(v, m):
    return ((v + m - 1) // m) * m


def _vmem_limit_bytes():
    """Generation-aware VMEM budget: ~96 MiB on v5e/v6e (128 MiB), ~48 MiB on v7x (64 MiB)."""
    cap = 64 * 1024 * 1024                      # conservative fallback (v7x physical VMEM)
    try:
        cap = int(pltpu.get_tpu_info().vmem_capacity_bytes)
    except Exception:
        pass
    return max(32 * 1024 * 1024, min((3 * cap) // 4, 96 * 1024 * 1024))


# ----------------------------- Pallas kernel -----------------------------
def termination_block_kernel(pa2_ref, x_ref, bias_ref, wall_ref, o_ref):
    """One packed block of graphs: out = (P A A)_blk @ X_blk @ Wall + per-graph bias."""
    f32 = jnp.float32
    # Dominant MXU op: contraction over all nodes in the block.
    gx = jnp.dot(pa2_ref[...], x_ref[...], preferred_element_type=f32)      # (gpb_pad, F_P)
    # Wall = W1 @ W2 @ (wf1 wf2 wf3); bias = (PA1)*b1c + counts*b2c + bc (precomputed/graph).
    o_ref[...] = jnp.dot(gx, wall_ref[...], preferred_element_type=f32) + bias_ref[...]


def termination_predictor_pallas(pa2_blk, x_blk, bias_blk, wall_p):
    """pa2_blk (NB,gpb_pad,npb_pad), x_blk (NB,npb_pad,F_P), bias_blk (NB,gpb_pad,1),
    wall_p (F_P,OUT_P)."""
    nb_blocks, gpb_pad, npb_pad = pa2_blk.shape
    f_p = x_blk.shape[-1]
    out_p = wall_p.shape[-1]

    flops = 2 * nb_blocks * (gpb_pad * npb_pad * f_p + gpb_pad * f_p * out_p)
    bytes_accessed = 4 * (pa2_blk.size + x_blk.size + bias_blk.size + wall_p.size +
                          nb_blocks * gpb_pad * out_p)

    def blk3(shape):      # per-grid-step block (leading block axis squeezed away)
        return pl.BlockSpec((None,) + shape, lambda i: (i, 0, 0))

    return pl.pallas_call(
        termination_block_kernel,
        out_shape=jax.ShapeDtypeStruct((nb_blocks, gpb_pad, out_p), jnp.float32),
        grid=(nb_blocks,),
        in_specs=[
            blk3((gpb_pad, npb_pad)),                     # PA2 rows (block-diagonal per graph)
            blk3((npb_pad, f_p)),                         # node features (padded to 32 lanes)
            blk3((gpb_pad, 1)),                           # per-graph folded bias
            pl.BlockSpec((f_p, out_p), lambda i: (0, 0)),  # Wall, resident in VMEM
        ],
        out_specs=pl.BlockSpec((None, gpb_pad, out_p), lambda i: (i, 0, 0)),
        compiler_params=pltpu.CompilerParams(
            dimension_semantics=("parallel",),            # shard blocks across TCs on v7x
            vmem_limit_bytes=_vmem_limit_bytes()),
        cost_estimate=pl.CostEstimate(
            flops=int(flops), transcendentals=0, bytes_accessed=int(bytes_accessed)),
    )(pa2_blk, x_blk, bias_blk, wall_p)


# ----------------------------- plain-JAX glue -----------------------------
def fold_params(p):
    """Exact collapse of the whole (affine) network into one (F,1) map + 3 bias scalars."""
    wc = p["wf1"] @ p["wf2"] @ p["wf3"]                              # (50, 1)
    bc = (p["bf1"] @ p["wf2"] + p["bf2"]) @ p["wf3"] + p["bf3"]      # (1, 1)
    w2c = p["w2"] @ wc                                               # (60, 1)
    wall = p["w1"] @ w2c                                             # (27, 1)
    b1c = p["b1"] @ w2c                                              # (1, 1)
    b2c = p["b2"] @ wc                                               # (1, 1)
    wall_p = jnp.pad(wall, ((0, F_P - F_IN), (0, OUT_P - D3)))       # (32, 128)
    return wall_p, b1c, b2c, bc


def build_pergraph_adjacency(edge_index, num_graphs, nodes_per_graph):
    """Per-graph dense D^-1/2 (A+I) D^-1/2, shape (G, npg, npg).  Never builds N x N.

    Assumes contiguous, uniform-size graphs with no cross-graph edges (PyG batching).
    # TODO(synk): generalize to variable-size graphs / enforce no cross-graph edges.
    """
    n = num_graphs * nodes_per_graph
    src, tgt = edge_index[0], edge_index[1]
    loop = jnp.arange(n, dtype=src.dtype)
    src = jnp.concatenate([src, loop])
    tgt = jnp.concatenate([tgt, loop])
    w = jnp.ones(src.shape[0], jnp.float32)
    deg = jnp.zeros(n, jnp.float32).at[tgt].add(w)
    dinv = jnp.where(deg > 0, 1.0 / jnp.sqrt(deg), 0.0)
    norm = dinv[src] * w * dinv[tgt]
    gid = tgt // nodes_per_graph
    a = jnp.zeros((num_graphs, nodes_per_graph, nodes_per_graph), jnp.float32)
    return a.at[gid, tgt % nodes_per_graph, src % nodes_per_graph].add(norm)


def build_blocked_inputs(edge_index, batch, x, b1c, b2c, bc,
                         num_graphs, nodes_per_graph, graphs_per_block):
    """All graph preprocessing for the collapsed kernel — vectorized, no N x N, no loops."""
    assert num_graphs % graphs_per_block == 0
    npg, gpb = nodes_per_graph, graphs_per_block
    nb = num_graphs // gpb
    npb = gpb * npg
    gpb_pad = _round_up(gpb, SUB)
    npb_pad = _round_up(npb, LANE)

    a_g = build_pergraph_adjacency(edge_index, num_graphs, npg)      # (G, npg, npg)
    colsum = a_g.sum(axis=1)                                         # (G, npg)  = 1^T A_g
    pa2 = jnp.einsum("gj,gjm->gm", colsum, a_g)                      # (G, npg)  = 1^T A_g^2
    pa1 = colsum.sum(axis=1, keepdims=True)                          # (G, 1)    = 1^T A_g 1
    cnt = jnp.zeros((num_graphs, 1), jnp.float32).at[batch, 0].add(1.0)   # (G, 1) = P @ 1
    bias = pa1 * b1c + cnt * b2c + bc                                # (G, 1)

    # Place per-graph PA2 rows block-diagonally inside each packed block (graphs disjoint).
    eye = jnp.eye(gpb, dtype=jnp.float32)
    pa2_blk = (pa2.reshape(nb, gpb, 1, npg) * eye[None, :, :, None]).reshape(nb, gpb, npb)
    pa2_blk = jnp.pad(pa2_blk, ((0, 0), (0, gpb_pad - gpb), (0, npb_pad - npb)))

    x_p = jnp.pad(x, ((0, 0), (0, F_P - F_IN)))                      # (N, 32)
    x_blk = jnp.pad(x_p.reshape(nb, npb, F_P), ((0, 0), (0, npb_pad - npb), (0, 0)))

    bias_blk = jnp.pad(bias.reshape(nb, gpb, 1), ((0, 0), (0, gpb_pad - gpb), (0, 0)))
    return pa2_blk, x_blk, bias_blk


@functools.partial(jax.jit,
                   static_argnames=("num_graphs", "nodes_per_graph", "graphs_per_block"))
def forward(params, x, edge_index, batch, *, num_graphs, nodes_per_graph, graphs_per_block):
    wall_p, b1c, b2c, bc = fold_params(params)
    pa2_blk, x_blk, bias_blk = build_blocked_inputs(
        edge_index, batch, x, b1c, b2c, bc, num_graphs, nodes_per_graph, graphs_per_block)
    out_pad = termination_predictor_pallas(pa2_blk, x_blk, bias_blk, wall_p)
    return out_pad[:, :graphs_per_block, :D3].reshape(num_graphs, D3)


# ----------------------------- reference & test -----------------------------
def build_gcn_adjacency(edge_index, num_nodes):
    """Dense D^-1/2 (A + I) D^-1/2 (reference only)."""
    src, tgt = edge_index[0], edge_index[1]
    loop = jnp.arange(num_nodes, dtype=src.dtype)
    src = jnp.concatenate([src, loop])
    tgt = jnp.concatenate([tgt, loop])
    w = jnp.ones(src.shape[0], jnp.float32)
    deg = jnp.zeros(num_nodes, jnp.float32).at[tgt].add(w)
    dinv = jnp.where(deg > 0, 1.0 / jnp.sqrt(deg), 0.0)
    norm = dinv[src] * w * dinv[tgt]
    return jnp.zeros((num_nodes, num_nodes), jnp.float32).at[tgt, src].add(norm)


def reference_forward(params, x, edge_index, batch, num_graphs):
    """Unfolded, unpadded pure-JAX reference matching the torch forward exactly."""
    a_hat = build_gcn_adjacency(edge_index, x.shape[0])
    pool = (batch[None, :] == jnp.arange(num_graphs)[:, None]).astype(jnp.float32)
    h1 = a_hat @ (x @ params["w1"]) + params["b1"]
    h2 = a_hat @ (h1 @ params["w2"]) + params["b2"]
    g = pool @ h2
    z = g @ params["wf1"] + params["bf1"]
    z = z @ params["wf2"] + params["bf2"]
    z = z @ params["wf3"] + params["bf3"]
    return z


def init_params(key):
    """Deterministic synthetic weights (stored as (in, out), i.e. W^T of torch)."""
    ks = jax.random.split(key, 10)
    def w(k, i, o):
        return (jax.random.normal(k, (i, o), jnp.float32) / jnp.sqrt(i)).astype(jnp.float32)
    return {
        "w1": w(ks[0], F_IN, H1), "b1": jax.random.normal(ks[1], (1, H1), jnp.float32) * 0.1,
        "w2": w(ks[2], H1, H2),   "b2": jax.random.normal(ks[3], (1, H2), jnp.float32) * 0.1,
        "wf1": w(ks[4], H2, D1),  "bf1": jax.random.normal(ks[5], (1, D1), jnp.float32) * 0.1,
        "wf2": w(ks[6], D1, D2),  "bf2": jax.random.normal(ks[7], (1, D2), jnp.float32) * 0.1,
        "wf3": w(ks[8], D2, D3),  "bf3": jax.random.normal(ks[9], (1, D3), jnp.float32) * 0.1,
    }


if __name__ == "__main__":
    key = jax.random.PRNGKey(0)
    k_x, k_p = jax.random.split(key)

    # 32 ring graphs x 16 nodes, packed 16 graphs per block -> 2 parallel grid steps,
    # npb = 256 per block (production would raise graphs_per_block so npb >= 512-1024).
    NUM_GRAPHS, NODES_PER_GRAPH, GRAPHS_PER_BLOCK = 32, 16, 16
    N = NUM_GRAPHS * NODES_PER_GRAPH
    edges = []
    for g in range(NUM_GRAPHS):
        base = g * NODES_PER_GRAPH
        for i in range(NODES_PER_GRAPH):
            a, b = base + i, base + (i + 1) % NODES_PER_GRAPH
            edges.append((a, b))
            edges.append((b, a))
    edge_index = jnp.array(edges, dtype=jnp.int32).T                       # (2, E)
    batch = jnp.repeat(jnp.arange(NUM_GRAPHS, dtype=jnp.int32), NODES_PER_GRAPH)
    x = jax.random.normal(k_x, (N, F_IN), jnp.float32)                     # G.x

    params = init_params(k_p)

    out = forward(params, x, edge_index, batch,
                  num_graphs=NUM_GRAPHS, nodes_per_graph=NODES_PER_GRAPH,
                  graphs_per_block=GRAPHS_PER_BLOCK)
    out = jax.block_until_ready(out)

    ref = reference_forward(params, x, edge_index, batch, NUM_GRAPHS)
    assert out.shape == (NUM_GRAPHS, D3), out.shape
    assert jnp.allclose(out, ref, atol=5e-4, rtol=5e-4), (out, ref)
    print("KERNEL_OK")
</pallas_src>

<mosaic_0001>
module attributes {stable_mosaic.version = 11 : i64} {
  func.func private @main(%arg0: i32) attributes {dimension_semantics = [#tpu.dimension_semantics<core_parallel>], iteration_bounds = array<i64: 2>, tpu.core_type = #tpu.core_type<sc_scalar_subcore>, window_params = []} {
    return
  }
}

module attributes {stable_mosaic.version = 11 : i64} {
  func.func private @main(%arg0: i32) attributes {dimension_semantics = [#tpu.dimension_semantics<core_parallel>], iteration_bounds = array<i64: 2>, tpu.core_type = #tpu.core_type<sc_scalar_subcore>, window_params = []} {
    return
  }
}

module attributes {stable_mosaic.version = 11 : i64} {
  func.func @termination_block_kernel(%arg0: i32, %arg1: memref<1x16x256xf32, #tpu.memory_space<vmem>>, %arg2: memref<1x256x32xf32, #tpu.memory_space<vmem>>, %arg3: memref<1x16x1xf32, #tpu.memory_space<vmem>>, %arg4: memref<32x128xf32, #tpu.memory_space<vmem>>, %arg5: memref<1x16x128xf32, #tpu.memory_space<vmem>>) attributes {dimension_semantics = [#tpu.dimension_semantics<parallel>], iteration_bounds = array<i64: 2>, scalar_prefetch = 0 : i64, scratch_operands = 0 : i64, tpu.core_type = #tpu.core_type<tc>, window_params = [{transform_indices = @transform_0, window_bounds = array<i64: 1, 16, 256>}, {transform_indices = @transform_1, window_bounds = array<i64: 1, 256, 32>}, {transform_indices = @transform_2, window_bounds = array<i64: 1, 16, 1>}, {pipeline_mode = #tpu.pipeline_mode<synchronous>, transform_indices = @transform_3, window_bounds = array<i64: 32, 128>}, {transform_indices = @transform_4, window_bounds = array<i64: 1, 16, 128>}]} {
    %c0 = arith.constant 0 : index
    %c0_0 = arith.constant 0 : index
    %c0_1 = arith.constant 0 : index
    %0 = vector.load %arg1[%c0, %c0_0, %c0_1] : memref<1x16x256xf32, #tpu.memory_space<vmem>>, vector<1x16x256xf32>
    %1 = vector.shape_cast %0 : vector<1x16x256xf32> to vector<16x256xf32>
    %c0_2 = arith.constant 0 : index
    %c0_3 = arith.constant 0 : index
    %c0_4 = arith.constant 0 : index
    %2 = vector.load %arg2[%c0_2, %c0_3, %c0_4] : memref<1x256x32xf32, #tpu.memory_space<vmem>>, vector<1x256x32xf32>
    %3 = vector.shape_cast %2 : vector<1x256x32xf32> to vector<256x32xf32>
    %cst = arith.constant dense<0.000000e+00> : vector<16x32xf32>
    %4 = tpu.matmul %1, %3, %cst {dimension_numbers = #tpu.dot_dimension_numbers<[1], [0], [0], [1], [0, 0, 1, 1], [], []>} : vector<16x256xf32>, vector<256x32xf32>, vector<16x32xf32> -> vector<16x32xf32>
    %c0_5 = arith.constant 0 : index
    %c0_6 = arith.constant 0 : index
    %5 = vector.load %arg4[%c0_5, %c0_6] : memref<32x128xf32, #tpu.memory_space<vmem>>, vector<32x128xf32>
    %cst_7 = arith.constant dense<0.000000e+00> : vector<16x128xf32>
    %6 = tpu.matmul %4, %5, %cst_7 {dimension_numbers = #tpu.dot_dimension_numbers<[1], [0], [0], [1], [0, 0, 1, 1], [], []>} : vector<16x32xf32>, vector<32x128xf32>, vector<16x128xf32> -> vector<16x128xf32>
    %c0_8 = arith.constant 0 : index
    %c0_9 = arith.constant 0 : index
    %c0_10 = arith.constant 0 : index
    %7 = vector.load %arg3[%c0_8, %c0_9, %c0_10] : memref<1x16x1xf32, #tpu.memory_space<vmem>>, vector<1x16x1xf32>
    %8 = vector.shape_cast %7 : vector<1x16x1xf32> to vector<16x1xf32>
    %9 = vector.broadcast %8 : vector<16x1xf32> to vector<16x128xf32>
    %10 = arith.addf %6, %9 : vector<16x128xf32>
    %c0_11 = arith.constant 0 : index
    %c0_12 = arith.constant 0 : index
    %c0_13 = arith.constant 0 : index
    %11 = vector.load %arg5[%c0_11, %c0_12, %c0_13] : memref<1x16x128xf32, #tpu.memory_space<vmem>>, vector<1x16x128xf32>
    %12 = vector.shape_cast %11 : vector<1x16x128xf32> to vector<16x128xf32>
    %13 = vector.shape_cast %10 : vector<16x128xf32> to vector<1x16x128xf32>
    tpu.vector_store %arg5[%c0_11, %c0_12, %c0_13], %13 {strides = array<i32>} : memref<1x16x128xf32, #tpu.memory_space<vmem>>, vector<1x16x128xf32>,
    return
  }
  func.func @transform_0(%arg0: i32) -> (i32, i32, i32) {
    %c0_i32 = arith.constant 0 : i32
    %c0_i32_0 = arith.constant 0 : i32
    %c0_i32_1 = arith.constant 0 : i32
    return %arg0, %c0_i32, %c0_i32_0 : i32, i32, i32
  }
  func.func @transform_1(%arg0: i32) -> (i32, i32, i32) {
    %c0_i32 = arith.constant 0 : i32
    %c0_i32_0 = arith.constant 0 : i32
    %c0_i32_1 = arith.constant 0 : i32
    return %arg0, %c0_i32, %c0_i32_0 : i32, i32, i32
  }
  func.func @transform_2(%arg0: i32) -> (i32, i32, i32) {
    %c0_i32 = arith.constant 0 : i32
    %c0_i32_0 = arith.constant 0 : i32
    %c0_i32_1 = arith.constant 0 : i32
    return %arg0, %c0_i32, %c0_i32_0 : i32, i32, i32
  }
  func.func @transform_3(%arg0: i32) -> (i32, i32) {
    %c0_i32 = arith.constant 0 : i32
    %c0_i32_0 = arith.constant 0 : i32
    %c0_i32_1 = arith.constant 0 : i32
    return %c0_i32, %c0_i32_0 : i32, i32
  }
  func.func @transform_4(%arg0: i32) -> (i32, i32, i32) {
    %c0_i32 = arith.constant 0 : i32
    %c0_i32_0 = arith.constant 0 : i32
    %c0_i32_1 = arith.constant 0 : i32
    return %arg0, %c0_i32, %c0_i32_0 : i32, i32, i32
  }
}

</mosaic_0001>

<bundles_post_ra>
// kernel: mul.16
= control target key start
LH: loop header
LB: loop body
LE: loop exit
PB: predicated region body
PF: predicated region fallthrough
CT: control target
= control target key end

     0   :  { %s56_s0 = inlined_call_operand.vmem [shape: f32[1536], index: 0, kind: input, shape index: {}]   ;;  %s57_s1 = inlined_call_operand.vmem [shape: f32[1536], index: 1, kind: input, shape index: {}]   ;;  %s58_s2 = inlined_call_operand.vmem [shape: f32[1536], index: 2, kind: output, shape index: {}]  }
   0x1   :  { %v3_v0 = vld [vmem:[%s56_s0] sm:$0xff]  ;;  %v20_v2 = vld [vmem:[%s56_s0 + $0x8] sm:$0xff] }
   0x2   :  { %v4_v1 = vld [vmem:[%s57_s1] sm:$0xff]  ;;  %v21_v4 = vld [vmem:[%s57_s1 + $0x8] sm:$0xff] }
   0x3   :  { %v7_v3 = vmul.f32 %v4_v1, %v3_v0  ;;  %v16_v5 = vmul.f32 %v21_v4, %v20_v2 }
   0x5   :  { %9 = vst [vmem:[%s58_s2] sm:$0xff] %v7_v3  ;;  %22 = vst [vmem:[%s58_s2 + $0x8] sm:$0xff] %v16_v5 }

// kernel: forward.1
= control target key start
LH: loop header
LB: loop body
LE: loop exit
PB: predicated region body
PF: predicated region fallthrough
CT: control target
= control target key end

     0   :  { %s648_s15 = smov 0   ;;  %s728_s0 = inlined_call_operand.vmem [shape: f32[2,16,256], index: 0, kind: input, shape index: {}]   ;;  %s729_s1 = inlined_call_operand.vmem [shape: f32[2,256,32], index: 1, kind: input, shape index: {}]   ;;  %s730_s2 = inlined_call_operand.vmem [shape: f32[2,16,1], index: 2, kind: input, shape index: {}]   ;;  %s731_s3 = inlined_call_operand.vmem [shape: f32[32,128], index: 3, kind: input, shape index: {}]   ;;  %s732_s4 = inlined_call_operand.vmem [shape: f32[2,16,128], index: 4, kind: output, shape index: {}]  }
   0x1 LB: > { %s528_s16 = sadd.s32 4294967295, %s620_s15   ;;  %p532_p0 = scmp.ge.s32.totalorder %s620_s15, 1  ;;  %s620_s15 = sphi %s648_s15, %s14_s15  }
   0x2   : > { %p182_p1 = scmp.lt.s32.totalorder %s620_s15, 3 }
   0x4   : > { %p183_p2 = pnand %p532_p0, %p182_p1 }
   0x5   : > { %p218_p3 = scmp.lt.s32.totalorder (!%p183_p2), %s528_s16, 1 }
   0x6   : > { %186 = sbr.rel (%p183_p2) target bundleno = 446 (0x1be), region = 36 }
   0xb   : > { %s734_s16 = smov (!%p218_p3, %s528_s16), 1  ;;  %v352_v36 = vld [vmem:[%s731_s3 + $0x18] sm:$0xff]  ;;  %v351_v37 = vld [vmem:[%s731_s3 + $0x10] sm:$0xff]  ;;  %v350_v38 = vld [vmem:[%s731_s3 + $0x8] sm:$0xff]  ;;  %v622_v40 = vmov 0   ;;  %vm365_vm0 = vcmask 261120  }
   0xc   : > { %s546_s17 = sshll.u32 %s734_s16, 8  ;;  %s545_s21 = sshll.u32 %s734_s16, 5  ;;  %593 = vmatprep.subr.mxu1 %v352_v36  ;;  %v349_v39 = vld [vmem:[%s731_s3] sm:$0xff]  ;;  %613 = vset.pattern.permute.xlu0 %v622_v40 }
   0xd   : > { %s662_s20 = scalar_lea.vmem %s729_s1, %s546_s17  ;;  %s678_s24 = scalar_lea.vmem %s728_s0, %s545_s21  ;;  %594 = vmatpush3.msra.mxu1 %v352_v36 }
   0xe   : > { %v273_v0 = vld [vmem:[%s662_s20 + $0xf8] sm:$0xff]  ;;  %v272_v2 = vld [vmem:[%s662_s20 + $0xf0] sm:$0xff]  ;;  %v271_v4 = vld [vmem:[%s662_s20 + $0xe8] sm:$0xff]  ;;  %595 = vmatprep.subr.mxu1 %v351_v37  ;;  %s547_s7 = sshll.u32 %s734_s16, 4 }
   0xf   : > { %v257_v1 = vld [vmem:[%s662_s20 + $0x78] sm:$0xff]  ;;  %549 = vmatprep.subr.mxu0 %v273_v0  ;;  %v256_v3 = vld [vmem:[%s662_s20 + $0x70] sm:$0xff]  ;;  %v255_v5 = vld [vmem:[%s662_s20 + $0x68] sm:$0xff]  ;;  %596 = vmatpush3.msra.mxu1 %v351_v37  ;;  %s232_s10 = scalar_lea.vmem %s730_s2, %s547_s7  ;;  %s237_s13 = scalar_lea.vmem %s732_s4, %s547_s7 }
  0x10   : > { %550 = vmatpush3.msra.mxu0 %v257_v1  ;;  %v270_v6 = vld [vmem:[%s662_s20 + $0xe0] sm:$0xff]  ;;  %v269_v8 = vld [vmem:[%s662_s20 + $0xd8] sm:$0xff]  ;;  %v268_v10 = vld [vmem:[%s662_s20 + $0xd0] sm:$0xff]  ;;  %597 = vmatprep.subr.mxu1 %v350_v38 }
  0x11   : > { %551 = vmatprep.subr.mxu0 %v272_v2  ;;  %v254_v7 = vld [vmem:[%s662_s20 + $0x60] sm:$0xff]  ;;  %v253_v9 = vld [vmem:[%s662_s20 + $0x58] sm:$0xff]  ;;  %v252_v11 = vld [vmem:[%s662_s20 + $0x50] sm:$0xff]  ;;  %598 = vmatpush3.msra.mxu1 %v350_v38 }
  0x12   : > { %552 = vmatpush3.msra.mxu0 %v256_v3  ;;  %v267_v12 = vld [vmem:[%s662_s20 + $0xc8] sm:$0xff]  ;;  %v266_v15 = vld [vmem:[%s662_s20 + $0xc0] sm:$0xff]  ;;  %v265_v17 = vld [vmem:[%s662_s20 + $0xb8] sm:$0xff]  ;;  %599 = vmatprep.subr.mxu1 %v349_v39 }
  0x13   : > { %553 = vmatprep.subr.mxu0 %v271_v4  ;;  %v239_v13 = vld [vmem:[%s678_s24 + $0x8] sm:$0xff]  ;;  %v250_v16 = vld [vmem:[%s662_s20 + $0x40] sm:$0xff]  ;;  %v249_v18 = vld [vmem:[%s662_s20 + $0x38] sm:$0xff]  ;;  %600 = vmatpush3.msra.mxu1 %v349_v39 }
  0x14   : > { %554 = vmatpush3.msra.mxu0 %v255_v5  ;;  %v251_v14 = vld [vmem:[%s662_s20 + $0x48] sm:$0xff]  ;;  %338 = vmatprep.mubr.f32.mxu0 %v239_v13  ;;  %v264_v19 = vld [vmem:[%s662_s20 + $0xb0] sm:$0xff]  ;;  %v262_v23 = vld [vmem:[%s662_s20 + $0xa0] sm:$0xff] }
  0x15   : > { %555 = vmatprep.subr.mxu0 %v270_v6  ;;  %v248_v20 = vld [vmem:[%s662_s20 + $0x30] sm:$0xff]  ;;  %v263_v21 = vld [vmem:[%s662_s20 + $0xa8] sm:$0xff]  ;;  %v246_v24 = vld [vmem:[%s662_s20 + $0x20] sm:$0xff] }
  0x16   : > { %556 = vmatpush3.msra.mxu0 %v254_v7  ;;  %v247_v22 = vld [vmem:[%s662_s20 + $0x28] sm:$0xff]  ;;  %v261_v25 = vld [vmem:[%s662_s20 + $0x98] sm:$0xff]  ;;  %v260_v27 = vld [vmem:[%s662_s20 + $0x90] sm:$0xff] }
  0x17   : > { %557 = vmatprep.subr.mxu0 %v269_v8  ;;  %v245_v26 = vld [vmem:[%s662_s20 + $0x18] sm:$0xff]  ;;  %v244_v28 = vld [vmem:[%s662_s20 + $0x10] sm:$0xff]  ;;  %v259_v29 = vld [vmem:[%s662_s20 + $0x88] sm:$0xff] }
  0x18   : > { %558 = vmatpush3.msra.mxu0 %v253_v9  ;;  %v243_v30 = vld [vmem:[%s662_s20 + $0x8] sm:$0xff]  ;;  %v258_v31 = vld [vmem:[%s662_s20 + $0x80] sm:$0xff]  ;;  %v241_v34 = vld [vmem:[%s678_s24 + $0x18] sm:$0xff] }
  0x19   : > { %559 = vmatprep.subr.mxu0 %v268_v10  ;;  %v242_v32 = vld [vmem:[%s662_s20] sm:$0xff]  ;;  %v240_v35 = vld [vmem:[%s678_s24 + $0x10] sm:$0xff]  ;;  %v354_v42 = vld [vmem:[%s232_s10 + $0x8] sm:$0xff] }
  0x1a   : > { %560 = vmatpush3.msra.mxu0 %v252_v11  ;;  %v238_v33 = vld [vmem:[%s678_s24] sm:$0xff] }
  0x1b   : > { %561 = vmatprep.subr.mxu0 %v267_v12  ;;  %v353_v41 = vld [vmem:[%s232_s10] sm:$0xff] }
  0x1c   : > { %562 = vmatpush3.msra.mxu0 %v251_v14  ;;  %357 = vperm.xlu0 %613, %v353_v41  }
  0x1d   : > { %563 = vmatprep.subr.mxu0 %v266_v15 }
  0x1e   : > { %564 = vmatpush3.msra.mxu0 %v250_v16 }
  0x1f   : > { %565 = vmatprep.subr.mxu0 %v265_v17 }
  0x20   : > { %566 = vmatpush3.msra.mxu0 %v249_v18  ;;  %362 = vperm.xlu0 %613, %v354_v42  }
  0x21   : > { %567 = vmatprep.subr.mxu0 %v264_v19 }
  0x22   : > { %568 = vmatpush3.msra.mxu0 %v248_v20 }
  0x23   : > { %569 = vmatprep.subr.mxu0 %v263_v21 }
  0x24   : > { %570 = vmatpush3.msra.mxu0 %v247_v22 }
  0x25   : > { %571 = vmatprep.subr.mxu0 %v262_v23 }
  0x26   : > { %572 = vmatpush3.msra.mxu0 %v246_v24 }
  0x27   : > { %573 = vmatprep.subr.mxu0 %v261_v25 }
  0x28   : > { %574 = vmatpush3.msra.mxu0 %v245_v26 }
  0x29   : > { %575 = vmatprep.subr.mxu0 %v260_v27 }
  0x2a   : > { %576 = vmatpush3.msra.mxu0 %v244_v28 }
  0x2b   : > { %577 = vmatprep.subr.mxu0 %v259_v29 }
  0x2c   : > { %578 = vmatpush3.msra.mxu0 %v243_v30 }
  0x2d   : > { %579 = vmatprep.subr.mxu0 %v258_v31 }
  0x2e   : > { %580 = vmatpush3.msra.mxu0 %v242_v32 }
  0x2f   : > { %339 = vmatmul.mubr.f32.vlgmr.msra.gmra.mxu0 %v238_v33 }
  0x30   : > { %343 = vmatprep.mubr.f32.mxu0 %v241_v34 }
  0x33   : > { %344 = vmatmul.mubr.f32.gmra.mxu0 %v240_v35 }
  0x97   : > { %v358_v49 = vpop.permute.xlu0 %357 }
  0x9b   : > { %v363_v50 = vpop.permute.xlu0 %362 }
  0xef   : > { %v581_v43 = vpop.f32.mrf.mxu0 }
  0xf1   : > { %v582_v44 = vpop.f32.mrf.mxu0 }
  0xf2   : > { %v583_v45 = vadd.f32 %v582_v44, %v581_v43 }
  0xf3   : > { %v584_v46 = vpop.f32.mrf.mxu0 }
  0xf4   : > { %601 = vmatprep.mubr.msk.f32.mxu1 %vm365_vm0, %v583_v45 }
  0xf5   : > { %v585_v47 = vpop.f32.mrf.mxu0 }
  0xf6   : > { %v586_v48 = vadd.f32 %v585_v47, %v584_v46 }
  0xf8   : > { %602 = vmatmul.mubr.msk.f32.vlgmr.msra.gmra.mxu1 %vm365_vm0, %v586_v48 }
 0x1b8   : > { %v603_v51 = vpop.f32.mrf.mxu1 }
 0x1b9   : > { %v444_v52 = vadd.f32 %v603_v51, %v363_v50 }
 0x1ba   : > { %v438_v53 = vpop.f32.mrf.mxu1 }
 0x1bb   : > { %448 = vst [vmem:[%s237_s13 + $0x8] sm:$0xff] %v444_v52  ;;  %v439_v54 = vadd.f32 %v438_v53, %v358_v49 }
 0x1bd   : > { %447 = vst [vmem:[%s237_s13] sm:$0xff] %v439_v54 }
 0x1be PF: > { %s14_s15 = sadd.s32 1, %s620_s15  }
 0x1bf   : > { %p11_p4 = scmp.ge.s32.totalorder %s14_s15, 4  }
 0x1c1   :  { %13 = sbr.rel (!%p11_p4) target bundleno = 1 (0x1), region = 72 }

</bundles_post_ra>
